<compile_context>
chip_gen: v7x
topology: tpu7x:2x2x1
jax: 0.10.0
libtpu: 0.0.40
codegen_flags: <defaults>
</compile_context>

<pallas_src>
import functools

import jax
import jax.numpy as jnp
from jax.experimental import pallas as pl
from jax.experimental.pallas import tpu as pltpu

GAMMA = 1e-10

# Per-input tile target.  2 MiB/input * 2 inputs * 2 pipeline buffers = 8 MiB,
# comfortably inside the default scoped-VMEM budget on every generation
# (16 MiB v5e, 32 MiB v6e/v7x) while large enough to amortize the ~0.35 us
# per-grid-step overhead.
_TARGET_TILE_BYTES = 2 << 20
# Lane-tile cap: bounds VMEM / slab vregs for extremely wide N and keeps the
# unrolled lane-fold short (<= 32 slices).
_MAX_BLOCK_COLS = 4096
_LANE = 128


def _round_up(x: int, m: int) -> int:
    return (x + m - 1) // m * m


def _pick_blocks(B: int, N: int, itemsize: int):
    """Choose (block_rows, block_cols) for the 2-D grid (cdiv tiling + mask)."""
    # dtype-native sublane multiple: f32 -> 8, bf16 -> 16, int8/fp8 -> 32.
    sublane = 32 // itemsize
    block_cols = min(_round_up(N, _LANE), _MAX_BLOCK_COLS)
    max_rows = max(
        sublane,
        (_TARGET_TILE_BYTES // (block_cols * itemsize)) // sublane * sublane,
    )
    block_rows = min(_round_up(B, sublane), max_rows)
    # v7x megacore: ensure >= 2 independent grid steps when possible so both
    # TensorCores get work (no effect on correctness; harmless on v5e/v6e).
    if pl.cdiv(B, block_rows) * pl.cdiv(N, block_cols) < 2 and block_cols > _LANE:
        block_cols = _round_up(pl.cdiv(block_cols, 2), _LANE)
    return block_rows, block_cols


def _bpr_partial_kernel(gamma: float, total_rows: int, total_cols: int,
                        need_mask: bool, pos_ref, neg_ref, out_ref):
    rows, cols = pos_ref.shape
    # Elementwise on VPU/EUP; compute in f32 regardless of input dtype
    # (v5e has no bf16 VPU/EUP).
    pos = pos_ref[...].astype(jnp.float32)
    neg = neg_ref[...].astype(jnp.float32)
    d = pos - neg
    # sigmoid(d) == 0.5*tanh(0.5*d) + 0.5 : one EUP transcendental instead of
    # exp + reciprocal, so 2 EUP pushes per element total (tanh + log).
    sig = 0.5 * jnp.tanh(0.5 * d) + 0.5
    val = -jnp.log(jnp.float32(gamma) + sig)

    if need_mask:
        # cdiv-style tiling: zero the padded rows/cols of the last tiles so
        # they don't bias the mean.
        r0 = pl.program_id(0) * rows
        c0 = pl.program_id(1) * cols
        rid = jax.lax.broadcasted_iota(jnp.int32, (rows, cols), 0) + r0
        cid = jax.lax.broadcasted_iota(jnp.int32, (rows, cols), 1) + c0
        val = jnp.where((rid < total_rows) & (cid < total_cols), val, 0.0)

    # Sublane fold: leading-axis reshape is tile-aligned / layout-free; the
    # sum over the leading axis lowers to pure VPU vreg+vreg adds (no XLU).
    slab = val.reshape(rows // 8, 8, cols).sum(axis=0)          # (8, cols)
    # Lane fold: static 128-wide slices (still pure VPU adds) collapse the
    # tile to a single-vreg (8, 128) partial, independent of N.
    acc = slab[:, 0:_LANE]
    for c in range(1, cols // _LANE):
        acc = acc + slab[:, c * _LANE:(c + 1) * _LANE]
    out_ref[...] = acc


def bpr_loss(pos_score: jax.Array, neg_score: jax.Array, *, gamma: float = GAMMA):
    """BPR loss: -mean(log(gamma + sigmoid(pos - neg))). Returns an f32 scalar."""
    assert pos_score.shape == neg_score.shape, "score shapes must match"

    # Collapse to 2-D (BPR scores are often 1-D (batch,) vectors).
    last = pos_score.shape[-1] if pos_score.ndim >= 1 else 1
    lead = 1
    for s in pos_score.shape[:-1]:
        lead *= s
    lead = max(lead, 1)
    pos2 = pos_score.reshape(lead, last)
    neg2 = neg_score.reshape(lead, last)

    B, N = pos2.shape
    itemsize = jnp.dtype(pos2.dtype).itemsize
    block_rows, block_cols = _pick_blocks(B, N, itemsize)
    num_row_tiles = pl.cdiv(B, block_rows)
    num_col_tiles = pl.cdiv(N, block_cols)
    need_mask = (B % block_rows != 0) or (N % block_cols != 0)

    out_rows = num_row_tiles * 8
    out_cols = num_col_tiles * _LANE
    in_bytes = 2 * B * N * itemsize
    out_bytes = out_rows * out_cols * 4

    partials = pl.pallas_call(
        functools.partial(_bpr_partial_kernel, gamma, B, N, need_mask),
        out_shape=jax.ShapeDtypeStruct((out_rows, out_cols), jnp.float32),
        grid_spec=pl.GridSpec(
            grid=(num_row_tiles, num_col_tiles),
            in_specs=[
                pl.BlockSpec((block_rows, block_cols), lambda i, j: (i, j)),
                pl.BlockSpec((block_rows, block_cols), lambda i, j: (i, j)),
            ],
            out_specs=pl.BlockSpec((8, _LANE), lambda i, j: (i, j)),
        ),
        compiler_params=pltpu.CompilerParams(
            # Independent grid steps -> megacore sharding on v7x.
            dimension_semantics=("parallel", "parallel"),
        ),
        cost_estimate=pl.CostEstimate(
            flops=7 * B * N,
            transcendentals=2 * B * N,
            bytes_accessed=in_bytes + out_bytes,
        ),
    )(pos2, neg2)

    # Tiny final reduction (out_rows x out_cols f32) + mean division in XLA.
    return jnp.sum(partials) / jnp.float32(B * N)


if __name__ == "__main__":
    key = jax.random.PRNGKey(0)
    k_pos, k_neg = jax.random.split(key)

    # Small, TPU-friendly shapes: 16 "users" x 256 sampled items.
    B, N = 16, 256
    pos_score = jax.random.normal(k_pos, (B, N), dtype=jnp.float32)
    neg_score = jax.random.normal(k_neg, (B, N), dtype=jnp.float32)

    loss = bpr_loss(pos_score, neg_score)
    loss = jax.block_until_ready(loss)

    # Pure-JAX reference for a sanity check.
    ref = -jnp.mean(jnp.log(GAMMA + jax.nn.sigmoid(pos_score - neg_score)))
    assert jnp.allclose(loss, ref, rtol=1e-5, atol=1e-6), (loss, ref)

    print("KERNEL_OK")
</pallas_src>

<mosaic_0001>
module attributes {stable_mosaic.version = 11 : i64} {
  func.func @_bpr_partial_kernel(%arg0: i32, %arg1: i32, %arg2: memref<16x128xf32, #tpu.memory_space<vmem>>, %arg3: memref<16x128xf32, #tpu.memory_space<vmem>>, %arg4: memref<8x128xf32, #tpu.memory_space<vmem>>) attributes {dimension_semantics = [#tpu.dimension_semantics<parallel>, #tpu.dimension_semantics<parallel>], iteration_bounds = array<i64: 1, 2>, scalar_prefetch = 0 : i64, scratch_operands = 0 : i64, tpu.core_type = #tpu.core_type<tc>, window_params = [{transform_indices = @transform_0, window_bounds = array<i64: 16, 128>}, {transform_indices = @transform_1, window_bounds = array<i64: 16, 128>}, {transform_indices = @transform_2, window_bounds = array<i64: 8, 128>}]} {
    %c0 = arith.constant 0 : index
    %c0_0 = arith.constant 0 : index
    %0 = vector.load %arg2[%c0, %c0_0] : memref<16x128xf32, #tpu.memory_space<vmem>>, vector<16x128xf32>
    %c0_1 = arith.constant 0 : index
    %c0_2 = arith.constant 0 : index
    %1 = vector.load %arg3[%c0_1, %c0_2] : memref<16x128xf32, #tpu.memory_space<vmem>>, vector<16x128xf32>
    %2 = arith.subf %0, %1 : vector<16x128xf32>
    %cst = arith.constant 5.000000e-01 : f32
    %3 = vector.broadcast %cst : f32 to vector<16x128xf32>
    %4 = arith.mulf %3, %2 : vector<16x128xf32>
    %5 = math.tanh %4 : vector<16x128xf32>
    %cst_3 = arith.constant 5.000000e-01 : f32
    %6 = vector.broadcast %cst_3 : f32 to vector<16x128xf32>
    %7 = arith.mulf %6, %5 : vector<16x128xf32>
    %cst_4 = arith.constant 5.000000e-01 : f32
    %8 = vector.broadcast %cst_4 : f32 to vector<16x128xf32>
    %9 = arith.addf %7, %8 : vector<16x128xf32>
    %cst_5 = arith.constant 1.000000e-10 : f32
    %10 = vector.broadcast %cst_5 : f32 to vector<16x128xf32>
    %11 = arith.addf %10, %9 : vector<16x128xf32>
    %12 = math.log %11 : vector<16x128xf32>
    %cst_6 = arith.constant 0.000000e+00 : f32
    %13 = vector.broadcast %cst_6 : f32 to vector<16x128xf32>
    %14 = arith.subf %13, %12 : vector<16x128xf32>
    %15 = vector.shape_cast %14 : vector<16x128xf32> to vector<2x8x128xf32>
    %cst_7 = arith.constant dense<0.000000e+00> : vector<8x128xf32>
    %16 = vector.multi_reduction <add>, %15, %cst_7 [0] : vector<2x8x128xf32> to vector<8x128xf32>
    %c0_8 = arith.constant 0 : index
    %c0_9 = arith.constant 0 : index
    %17 = vector.load %arg4[%c0_8, %c0_9] : memref<8x128xf32, #tpu.memory_space<vmem>>, vector<8x128xf32>
    tpu.vector_store %arg4[%c0_8, %c0_9], %16 {strides = array<i32>} : memref<8x128xf32, #tpu.memory_space<vmem>>, vector<8x128xf32>,
    return
  }
  func.func @transform_0(%arg0: i32, %arg1: i32) -> (i32, i32) {
    %c0_i32 = arith.constant 0 : i32
    return %arg0, %arg1 : i32, i32
  }
  func.func @transform_1(%arg0: i32, %arg1: i32) -> (i32, i32) {
    %c0_i32 = arith.constant 0 : i32
    return %arg0, %arg1 : i32, i32
  }
  func.func @transform_2(%arg0: i32, %arg1: i32) -> (i32, i32) {
    %c0_i32 = arith.constant 0 : i32
    return %arg0, %arg1 : i32, i32
  }
}

</mosaic_0001>

<bundles_post_ra>
// kernel: tpu_custom_call.1
= control target key start
LH: loop header
LB: loop body
LE: loop exit
PB: predicated region body
PF: predicated region fallthrough
CT: control target
= control target key end

     0   :  { %7 = vsyncpa [#allocation3], 0  ;;  %s869_s0 = inlined_call_operand.hbm [shape: f32[16,256], index: 0, kind: input, shape index: {}]   ;;  %s870_s1 = inlined_call_operand.hbm [shape: f32[16,256], index: 1, kind: input, shape index: {}]   ;;  %s871_s2 = inlined_call_operand.hbm [shape: f32[8,256], index: 2, kind: output, shape index: {}]  }
   0x1   :  { %9 = vsyncpa [#allocation3 + $0x1], 0 }
   0x2   :  { %10 = vsyncpa [#allocation6], 0 }
   0x3   :  { %12 = vsyncpa [#allocation6 + $0x1], 0 }
   0x4   :  { %13 = vsyncpa [#allocation4], 0 }
   0x5   :  { %15 = vsyncpa [#allocation4 + $0x1], 0  ;;  %s636_s9 = smov 0   ;;  %s638_s10 = smov 0  }
   0x6   :  { %s640_s11 = smov 0   ;;  %s642_s12 = smov 0  }
   0x7   :  { %s644_s13 = smov 0   ;;  %s646_s14 = smov 0  }
   0x8 LB: > { %s373_s15 = sadd.s32 4294967295, %s613_s14   ;;  %s374_s16 = sadd.s32 4294967294, %s613_s14   ;;  %s613_s14 = sphi %s646_s14, %s21_s14   ;;  %s609_s13 = sphi %s644_s13, %s888_s13   ;;  %s605_s12 = sphi %s642_s12, %s887_s12   ;;  %s601_s11 = sphi %s640_s11, %s886_s11   ;;  %s597_s10 = sphi %s638_s10, %s885_s10   ;;  %s593_s9 = sphi %s636_s9, %s884_s9  }
   0x9   : > { %s30_s17 = sadd.s32 1, %s609_s13  ;;  %s42_s18 = sadd.s32 1, %s601_s11 }
   0xa   : > { %p31_p0 = scmp.ge.s32.totalorder %s30_s17, 2  ;;  %p49_p1 = scmp.ne.s32.totalorder %s601_s11, %s597_s10 }
   0xb   : > { %p50_p2 = scmp.eq.s32.totalorder %s613_s14, 0  ;;  %p55_p3 = scmp.ne.s32.totalorder %s597_s10, %s593_s9 }
   0xc   : > { %s890_s17 = smov (%p31_p0, %s30_s17), 0  ;;  %p56_p5 = scmp.eq.s32.totalorder %s373_s15, 0 }
   0xd   : > { %p677_p4 = por %p50_p2, %p49_p1  ;;  %s38_s20 = ssub.s32 %s609_s13, %s890_s17 }
   0xe   : > { %p109_p6 = scmp.eq.s32.totalorder %s373_s15, 1  ;;  %p40_p7 = scmp.eq.s32.totalorder %s38_s20, 0 }
   0xf   : > { %p683_p8 = por %p56_p5, %p55_p3  ;;  %p115_p10 = scmp.eq.s32.totalorder %s374_s16, 1 }
  0x10   : > { %p687_p9 = por %p109_p6, %p49_p1  ;;  %p406_p13 = scmp.lt.s32.totalorder %s613_s14, 2 }
  0x11   : > { %s875_s21 = scalar_select %p683_p8, 1, 0 }
  0x12   : > { %s876_s22 = scalar_select %p687_p9, 1, 0 }
  0x13   : > { %s692_s23 = scalar_select %p40_p7, %s601_s11, %s42_s18  }
  0x14   : > { %p694_p11 = por %p115_p10, %p55_p3  ;;  %s701_s25 = sand.u32 1, %s601_s11  }
  0x15   : > { %s377_s26 = sshll.u32 %s701_s25, 4  ;;  %s378_s27 = sshll.u32 %s609_s13, 7 }
  0x16   : > { %s877_s24 = scalar_select %p694_p11, 1, 0 }
  0x17   : > { %s710_s30 = scalar_lea.hbm %s869_s0, %s378_s27  ;;  %s139_s3 = scalar_lea.vmem [#allocation2], %s377_s26 }
  0x18   : > { %s148_s4 = sshll.u32 %s139_s3, 4  ;;  %p718_p0 = pnand %p406_p13, %p677_p4  ;;  %s714_s4 = int_to_ptr.vmem [resolvable:$true] %s148_s4 }
  0x19   : > { %s136_s6 = scalar_lea.sflag [#allocation3], %s701_s25  ;;  %s467_s7 = scalar_lea.hbm %s710_s30, 256 }
  0x1a   : > { %p468_p1 = scmp.ne.s32.totalorder %s710_s30, %s467_s7  ;;  %p469_p2 = pneg %p718_p0 }
  0x1b   : > { %s472_s16 = scalar_lea.hbm %s869_s0, 512  ;;  %p473_p4 = scmp.lt.u32.totalorder %s710_s30, %s869_s0 }
  0x1c   : > { %p470_p3 = pnand %p469_p2, %p468_p1  ;;  %p474_p6 = scmp.lt.u32.totalorder %s472_s16, %s467_s7 }
  0x1d   : > { %p476_p10 = scmp.lt.u32.totalorder %s467_s7, %s710_s30 }
  0x1e   : > { %p471_p5 = pneg %p470_p3  ;;  %p475_p7 = por %p474_p6, %p473_p4 }
  0x20   : > { %p477_p13 = por %p476_p10, %p475_p7 }
  0x22   : > { %p478_p12 = pnand %p477_p13, %p471_p5 }
  0x24   : > { %481 = shalt.err (!%p478_p12)
}
  0x25   : > { %s482_s20 = scalar_lea.vmem %s714_s4, 256  ;;  %s615_s28 = smov [#allocation2]  }
  0x26   : > { %p483_p1 = scmp.ne.s32.totalorder %s714_s4, %s482_s20  ;;  %s487_s29 = sshll.u32 %s615_s28, 4  ;;  %s488_s29 = int_to_ptr.vmem [resolvable:$false] %s487_s29 }
  0x27   : > { %s489_s3 = scalar_lea.vmem %s488_s29, 512  ;;  %p490_p9 = scmp.lt.s32.totalorder %s714_s4, %s488_s29 }
  0x28   : > { %p485_p3 = pnand %p483_p1, %p469_p2  ;;  %p491_p4 = scmp.lt.s32.totalorder %s489_s3, %s482_s20 }
  0x2a   : > { %p486_p11 = pneg %p485_p3  ;;  %p492_p6 = por %p491_p4, %p490_p9 }
  0x2c   : > { %p493_p7 = pnand %p492_p6, %p486_p11 }
  0x2e   : > { %496 = shalt.err (!%p493_p7)
}
  0x2f   : > { %s616_s7 = smov 256   ;;  %s617_s8 = smov 128  }
  0x30   : > { %s618_s15 = smov 8   ;;  %p381_p9 = scmp.ge.s32.totalorder %s613_s14, 1 }
  0x31   : > { %398 = dma.hbm_to_vmem [thread:$0]  (!%p718_p0), %s710_s30, 256, %s714_s4, %s136_s6, %s616_s7, %s617_s8, %s618_s15  }
  0x32   : > { %p179_p11 = scmp.lt.s32.totalorder %s613_s14, 3  ;;  %s764_s20 = scalar_lea.hbm %s870_s1, %s378_s27 }
  0x33   : > { %s162_s28 = scalar_lea.vmem [#allocation5], %s377_s26  ;;  %s159_s30 = scalar_lea.sflag [#allocation6], %s701_s25 }
  0x34   : > { %p755_p12 = pnand %p381_p9, %p179_p11  ;;  %s171_s29 = sshll.u32 %s162_s28, 4  ;;  %s768_s29 = int_to_ptr.vmem [resolvable:$true] %s171_s29 }
  0x35   : > { %s497_s4 = scalar_lea.hbm %s764_s20, 256  ;;  %s502_s27 = scalar_lea.hbm %s870_s1, 512 }
  0x36   : > { %p498_p5 = scmp.ne.s32.totalorder %s764_s20, %s497_s4  ;;  %p503_p1 = scmp.lt.u32.totalorder %s764_s20, %s870_s1 }
  0x37   : > { %p504_p3 = scmp.lt.u32.totalorder %s502_s27, %s497_s4  ;;  %p506_p6 = scmp.lt.u32.totalorder %s497_s4, %s764_s20 }
  0x38   : > { %p500_p10 = pnand %p498_p5, %p469_p2 }
  0x39   : > { %p505_p4 = por %p504_p3, %p503_p1 }
  0x3a   : > { %p501_p13 = pneg %p500_p10 }
  0x3b   : > { %p507_p7 = por %p506_p6, %p505_p4 }
  0x3d   : > { %p508_p9 = pnand %p507_p7, %p501_p13 }
  0x3f   : > { %511 = shalt.err (!%p508_p9)
}
  0x40   : > { %s512_s26 = scalar_lea.vmem %s768_s29, 256  ;;  %s619_s28 = smov [#allocation5]  }
  0x41   : > { %p513_p11 = scmp.ne.s32.totalorder %s768_s29, %s512_s26  ;;  %s517_s6 = sshll.u32 %s619_s28, 4  ;;  %s518_s6 = int_to_ptr.vmem [resolvable:$false] %s517_s6 }
  0x42   : > { %s519_s3 = scalar_lea.vmem %s518_s6, 512  ;;  %p520_p8 = scmp.lt.s32.totalorder %s768_s29, %s518_s6 }
  0x43   : > { %p515_p5 = pnand %p513_p11, %p469_p2  ;;  %p521_p1 = scmp.lt.s32.totalorder %s519_s3, %s512_s26 }
  0x45   : > { %p516_p10 = pneg %p515_p5  ;;  %p522_p3 = por %p521_p1, %p520_p8 }
  0x47   : > { %p523_p4 = pnand %p522_p3, %p516_p10 }
  0x49   : > { %526 = shalt.err (!%p523_p4)
}
  0x4a   : > { %401 = dma.hbm_to_vmem [thread:$0]  (!%p718_p0), %s764_s20, 256, %s768_s29, %s159_s30, %s616_s7, %s617_s8, %s618_s15  }
  0x4b   : > { %183 = sbr.rel (%p755_p12) target bundleno = 140 (0x8c), region = 28  ;;  %s802_s4 = sand.u32 (!%p755_p12), 1, %s597_s10  }
  0x4c   : > { %s382_s27 = sshll.u32 (!%p755_p12), %s802_s4, 4  ;;  %s186_s18 = scalar_lea.sflag (!%p755_p12), [#allocation3], %s802_s4 }
  0x4d   : > { %s189_s5 = scalar_lea.vmem (!%p755_p12), [#allocation2], %s382_s27  ;;  %p880_p8 = scmp.ne.s32.totalorder (!%p755_p12), %s875_s21, 0 }
  0x52   : > { %580 = dma.done.wait (%p880_p8), %s186_s18, 256  }
  0x53   : > { %582 = vsyncadd (%p880_p8), %s186_s18, 4294967040  ;;  %s195_s25 = scalar_lea.sflag [#allocation6], %s802_s4  ;;  %s198_s7 = scalar_lea.vmem [#allocation5], %s382_s27 }
  0x54   : > { %584 = dma.done.wait (%p880_p8), %s195_s25, 256  }
  0x55   : > { %586 = vsyncadd (%p880_p8), %s195_s25, 4294967040  ;;  %v226_v0 = vld [vmem:[%s189_s5] sm:$0xff]  ;;  %v227_v1 = vld [vmem:[%s189_s5 + $0x8] sm:$0xff]  ;;  %s384_s21 = sshll.u32 %s802_s4, 3  ;;  %s386_s16 = sshll.u32 %s605_s12, 7 }
  0x56   : > { %v228_v2 = vld [vmem:[%s198_s7] sm:$0xff]  ;;  %v229_v3 = vld [vmem:[%s198_s7 + $0x8] sm:$0xff]  ;;  %s223_s8 = scalar_lea.vmem [#allocation7], %s384_s21  ;;  %s822_s30 = scalar_lea.hbm %s871_s2, %s386_s16 }
  0x57   : > { %v230_v4 = vsub.f32 %v226_v0, %v228_v2  ;;  %v231_v5 = vsub.f32 %v227_v1, %v229_v3  ;;  %s266_s15 = sshll.u32 %s223_s8, 4  ;;  %s251_s19 = scalar_lea.sflag [#allocation4], %s802_s4  ;;  %s817_s15 = int_to_ptr.vmem [resolvable:$true] %s266_s15 }
  0x58   : > { %s527_s26 = scalar_lea.vmem %s817_s15, 128  ;;  %p881_p2 = scmp.ne.s32.totalorder %s876_s22, 0 }
  0x59   : > { %v232_v6 = vmul.f32 0.5, %v230_v4  ;;  %v233_v7 = vmul.f32 0.5, %v231_v5  ;;  %p528_p0 = scmp.ne.s32.totalorder %s817_s15, %s527_s26  ;;  %s620_s12 = smov [#allocation7]  }
  0x5a   : > { %s531_s28 = sshll.u32 %s620_s12, 4  ;;  %s532_s28 = int_to_ptr.vmem [resolvable:$false] %s531_s28 }
  0x5b   : > { %459 = vtanh.f32 %v232_v6  ;;  %p529_p12 = pnand %p528_p0, %p881_p2  ;;  %s533_s6 = scalar_lea.vmem %s532_s28, 256 }
  0x5c   : > { %461 = vtanh.f32 %v233_v7  ;;  %p534_p6 = scmp.lt.s32.totalorder %s817_s15, %s532_s28  ;;  %p535_p7 = scmp.lt.s32.totalorder %s533_s6, %s527_s26 }
  0x5d   : > { %p530_p13 = pneg %p529_p12 }
  0x5e   : > { %p536_p9 = por %p535_p7, %p534_p6 }
  0x60   : > { %p537_p11 = pnand %p536_p9, %p530_p13 }
  0x65   : > { %v460_v8 = vpop.eup %459 }
  0x66   : > { %v462_v9 = vpop.eup %461  ;;  %v236_v10 = vmul.f32 0.5, %v460_v8 }
  0x67   : > { %v237_v11 = vmul.f32 0.5, %v462_v9 }
  0x68   : > { %v238_v12 = vadd.f32 0.5, %v236_v10 }
  0x69   : > { %v239_v13 = vadd.f32 0.5, %v237_v11 }
  0x6a   : > { %v240_v14 = vadd.f32 1e-10, %v238_v12 }
  0x6b   : > { %v241_v15 = vadd.f32 1e-10, %v239_v13 }
  0x6c   : > { %463 = vlog2.f32 %v240_v14 }
  0x6d   : > { %465 = vlog2.f32 %v241_v15 }
  0x76   : > { %v464_v16 = vpop.eup %463 }
  0x77   : > { %v466_v17 = vpop.eup %465  ;;  %v243_v18 = vmul.f32 0.6931472, %v464_v16 }
  0x78   : > { %v245_v19 = vmul.f32 0.6931472, %v466_v17 }
  0x79   : > { %v246_v20 = vsub.f32 0.0, %v243_v18 }
  0x7a   : > { %v247_v21 = vsub.f32 0.0, %v245_v19 }
  0x7c   : > { %v248_v22 = vadd.f32 %v247_v21, %v246_v20 }
  0x7e   : > { %249 = vst [vmem:[%s223_s8] sm:$0xff] %v248_v22 }
  0x7f   : > { %540 = shalt.err (!%p537_p11)
}
  0x80   : > { %s541_s3 = scalar_lea.hbm %s822_s30, 128  ;;  %s545_s18 = scalar_lea.hbm %s871_s2, 256 }
  0x81   : > { %p542_p5 = scmp.ne.s32.totalorder %s822_s30, %s541_s3  ;;  %p546_p3 = scmp.lt.u32.totalorder %s822_s30, %s871_s2 }
  0x82   : > { %p547_p4 = scmp.lt.u32.totalorder %s545_s18, %s541_s3  ;;  %p549_p0 = scmp.lt.u32.totalorder %s541_s3, %s822_s30 }
  0x83   : > { %p543_p10 = pnand %p542_p5, %p881_p2 }
  0x84   : > { %p548_p8 = por %p547_p4, %p546_p3 }
  0x85   : > { %p544_p1 = pneg %p543_p10 }
  0x86   : > { %p550_p12 = por %p549_p0, %p548_p8 }
  0x88   : > { %p551_p13 = pnand %p550_p12, %p544_p1 }
  0x8a   : > { %554 = shalt.err (!%p551_p13)
}
  0x8b   : > { %393 = dma.vmem_to_hbm [thread:$0]  (%p881_p2), %s817_s15, 128, %s822_s30, %s251_s19  }
  0x8c PF: > { %s278_s7 = sand.u32 1, %s593_s9   ;;  %p882_p6 = scmp.ne.s32.totalorder %s877_s24, 0 }
  0x8d   : > { %p883_p7 = scmp.ge.s32.totalorder %s613_s14, 2  ;;  %s279_s21 = scalar_lea.sflag [#allocation4], %s278_s7 }
  0x8f   : > { %p403_p9 = pnand %p883_p7, %p882_p6 }
  0x91   : > { %588 = dma.done.wait (!%p403_p9), %s279_s21, 128  }
  0x92   : > { %590 = vsyncadd (!%p403_p9), %s279_s21, 4294967168  ;;  %s21_s14 = sadd.s32 1, %s613_s14   ;;  %s884_s9 = smov %s597_s10 }
  0x93   : > { %p18_p11 = scmp.ge.s32.totalorder %s21_s14, 4   ;;  %s885_s10 = smov %s601_s11 }
  0x94   : > { %s886_s11 = smov %s692_s23  ;;  %s887_s12 = smov %s609_s13 }
  0x95   : > { %s888_s13 = smov %s890_s17  ;;  %20 = sbr.rel (!%p18_p11) target bundleno = 8 (0x8), region = 86 }
  0x9c   :  { %284 = vsyncpa [#allocation3], 1 }
  0x9d   :  { %286 = vsyncpa [#allocation3 + $0x1], 1 }
  0x9e   :  { %287 = vsyncpa [#allocation6], 1 }
  0x9f   :  { %289 = vsyncpa [#allocation6 + $0x1], 1 }
  0xa0   :  { %290 = vsyncpa [#allocation4], 1 }
  0xa1   :  { %292 = vsyncpa [#allocation4 + $0x1], 1 }

</bundles_post_ra>
